<compile_context>
chip_gen: v7x
topology: tpu7x:2x2x1
jax: 0.10.0
libtpu: 0.0.40
codegen_flags: <defaults>
</compile_context>

<pallas_src>
import functools

import jax
import jax.numpy as jnp
from jax.experimental import pallas as pl
from jax.experimental.pallas import tpu as pltpu


_LANE_CHOICES = (512, 256, 128)       # lane-dense slab widths (multiples of 128)
_BLOCK_BYTES = 4 * 1024 * 1024        # per-input block; double-buffered by Pallas
_VMEM_LIMIT = 32 * 1024 * 1024        # 2 inputs x 2 bufs x 4 MiB = 16 MiB + scratch
_NCORES = 2                           # v7x has 2 TCs; harmless serial split elsewhere


def _mse_kernel(x_ref, t_ref, out_ref, acc_ref, *, total_rows, inner_steps, fold8):
    """Accumulate (x - t)^2 into a VMEM partial-sum accumulator per step; the
    single full reduce runs only on the last inner step of each core."""
    p = pl.program_id(0)
    s = pl.program_id(1)

    @pl.when(s == 0)
    def _():
        acc_ref[...] = jnp.zeros_like(acc_ref)

    tr, lanes = x_ref.shape
    # First (global) row covered by this logical block.  Blocks whose logical
    # index runs past the array (surplus steps clamped by the index_map, or the
    # ragged tail of the last real block) are zeroed by the row mask below.
    row0 = (p * inner_steps + s) * tr
    valid_rows = total_rows - row0
    row_ids = jax.lax.broadcasted_iota(jnp.int32, (tr, 1), 0)
    row_mask = row_ids < valid_rows

    d = x_ref[...].astype(jnp.float32) - t_ref[...].astype(jnp.float32)
    sq = jnp.where(row_mask, d * d, 0.0)

    if fold8:
        # Fold whole 8-row sublane tiles onto the (8, lanes) accumulator with
        # pure VPU adds (layout-preserving reshape, no per-step XLU reduce).
        acc_ref[...] += jnp.sum(sq.reshape(tr // 8, 8, lanes), axis=0)
    else:
        # Tiny single-block case (tr == total rows, not a multiple of 8).
        acc_ref[...] += jnp.sum(sq, axis=0, keepdims=True)

    @pl.when(s == inner_steps - 1)
    def _():
        out_ref[0, 0] = jnp.sum(acc_ref[...])


def mse_loss_pallas(a, b, *, block_bytes=_BLOCK_BYTES):
    """Scalar f32 mean((a - b)^2) for arbitrary (same-shaped) arrays."""
    assert a.shape == b.shape, (a.shape, b.shape)
    n = int(a.size)

    # Lane-dense 2D view.  If n is a multiple of one of the lane widths the
    # reshape is a free bitcast; otherwise fall back to a minimal zero-pad
    # (padded positions contribute (0 - 0)^2 = 0; the mean divisor stays n).
    lanes = None
    for cand in _LANE_CHOICES:
        if n % cand == 0:
            lanes = cand
            break
    a_flat = a.reshape(-1)
    b_flat = b.reshape(-1)
    if lanes is None:
        lanes = _LANE_CHOICES[0]
        rows = -(-n // lanes)
        pad = rows * lanes - n
        a_flat = jnp.pad(a_flat, (0, pad))
        b_flat = jnp.pad(b_flat, (0, pad))
    rows = a_flat.size // lanes
    a2 = a_flat.reshape(rows, lanes)
    b2 = b_flat.reshape(rows, lanes)

    # Row-block size: ~block_bytes of f32 per input block, multiple of 8 rows.
    tr = max(8, (block_bytes // (lanes * 4)) // 8 * 8)
    if rows <= tr:
        tr = rows                      # single block spanning the full array
    nblocks = -(-rows // tr)
    ncores = _NCORES if nblocks >= _NCORES else 1
    inner_steps = -(-nblocks // ncores)
    fold8 = (tr % 8 == 0)

    def in_index_map(p, s):
        # Clamp the (at most ncores - 1) surplus grid steps onto the last real
        # block; their contribution is zeroed by the in-kernel row mask.
        return (jnp.minimum(p * inner_steps + s, nblocks - 1), 0)

    kernel = functools.partial(
        _mse_kernel, total_rows=rows, inner_steps=inner_steps, fold8=fold8)

    partial_sums = pl.pallas_call(
        kernel,
        out_shape=jax.ShapeDtypeStruct((ncores, 1), jnp.float32),
        grid_spec=pltpu.PrefetchScalarGridSpec(
            num_scalar_prefetch=0,
            grid=(ncores, inner_steps),
            in_specs=[
                pl.BlockSpec((tr, lanes), in_index_map),
                pl.BlockSpec((tr, lanes), in_index_map),
            ],
            out_specs=pl.BlockSpec(
                (1, 1), lambda p, s: (p, 0), memory_space=pltpu.SMEM),
            scratch_shapes=[
                pltpu.VMEM((8 if fold8 else 1, lanes), jnp.float32)],
        ),
        compiler_params=pltpu.CompilerParams(
            dimension_semantics=("parallel", "arbitrary"),
            vmem_limit_bytes=_VMEM_LIMIT,
        ),
    )(a2, b2)

    # Per-core partial sums -> scalar mean (true element count, not padded).
    return jnp.sum(partial_sums) * jnp.float32(1.0 / n)


class ContentLoss:
    """JAX/Pallas port of the PyTorch ContentLoss module."""

    def __init__(self, target):
        # target.detach() -> treat as a constant (stop gradients).
        self.target = jax.lax.stop_gradient(target)
        # F.mse_loss(target, target) is identically zero; skip the HBM pass.
        self.loss = jnp.float32(0.0)

    def __call__(self, x):
        self.loss = mse_loss_pallas(x, self.target)
        return x  # identity pass-through, same as PyTorch forward


if __name__ == "__main__":
    key = jax.random.PRNGKey(0)
    k1, k2 = jax.random.split(key)

    # Small NCHW shapes: batch=2, channels=4, spatial=16x16.
    B, C, H, W = 2, 4, 16, 16
    target = jax.random.normal(k1, (B, C, H, W), dtype=jnp.float32)
    x = jax.random.normal(k2, (B, C, H, W), dtype=jnp.float32)

    module = ContentLoss(target)
    out = module(x)

    out = jax.block_until_ready(out)
    loss = jax.block_until_ready(module.loss)

    # Sanity check against plain-JAX reference.
    ref_loss = jnp.mean((x - target) ** 2)
    assert jnp.allclose(loss, ref_loss, rtol=1e-5, atol=1e-6), (loss, ref_loss)
    assert jnp.array_equal(out, x)
    assert jnp.allclose(ContentLoss(target).loss, 0.0)

    # Extra coverage of the multi-block / two-core / ragged-tail path with a
    # deliberately small block size: 70 rows x 512 lanes with 32-row blocks ->
    # grid (2, 2), one clamped surplus step and a 6-row partial last block.
    k3, k4 = jax.random.split(k2)
    xa = jax.random.normal(k3, (70, 512), dtype=jnp.float32)
    xb = jax.random.normal(k4, (70, 512), dtype=jnp.float32)
    small_blocks = jax.block_until_ready(
        mse_loss_pallas(xa, xb, block_bytes=32 * 512 * 4))
    assert jnp.allclose(small_blocks, jnp.mean((xa - xb) ** 2),
                        rtol=1e-5, atol=1e-6)

    # Non-multiple-of-128 element count exercises the padded fallback path.
    ya = jax.random.normal(k3, (2, 3, 15, 17), dtype=jnp.float32)
    yb = jax.random.normal(k4, (2, 3, 15, 17), dtype=jnp.float32)
    ragged = jax.block_until_ready(mse_loss_pallas(ya, yb))
    assert jnp.allclose(ragged, jnp.mean((ya - yb) ** 2), rtol=1e-5, atol=1e-6)

    print("KERNEL_OK")
</pallas_src>

<mosaic_0001>
module attributes {stable_mosaic.version = 11 : i64} {
  func.func @_mse_kernel(%arg0: i32, %arg1: i32, %arg2: memref<4x512xf32, #tpu.memory_space<vmem>>, %arg3: memref<4x512xf32, #tpu.memory_space<vmem>>, %arg4: memref<1x1xf32, #tpu.memory_space<smem>>, %arg5: memref<1x512xf32, #tpu.memory_space<vmem>>) attributes {dimension_semantics = [#tpu.dimension_semantics<parallel>, #tpu.dimension_semantics<arbitrary>], iteration_bounds = array<i64: 1, 1>, scalar_prefetch = 0 : i64, scratch_operands = 1 : i64, tpu.core_type = #tpu.core_type<tc>, window_params = [{transform_indices = @transform_0, window_bounds = array<i64: 4, 512>}, {transform_indices = @transform_1, window_bounds = array<i64: 4, 512>}, {transform_indices = @transform_2, window_bounds = array<i64: 1, 1>}]} {
    %c0_i32 = arith.constant 0 : i32
    %0 = arith.cmpi eq, %arg1, %c0_i32 : i32
    %1 = arith.extui %0 : i1 to i32
    %c0_i32_0 = arith.constant 0 : i32
    %2 = arith.cmpi ne, %1, %c0_i32_0 : i32
    scf.if %2 {
      %cst_12 = arith.constant 0.000000e+00 : f32
      %26 = vector.broadcast %cst_12 : f32 to vector<1x512xf32>
      %c0_13 = arith.constant 0 : index
      %c0_14 = arith.constant 0 : index
      %27 = vector.load %arg5[%c0_13, %c0_14] : memref<1x512xf32, #tpu.memory_space<vmem>>, vector<1x512xf32>
      tpu.vector_store %arg5[%c0_13, %c0_14], %26 {strides = array<i32>} : memref<1x512xf32, #tpu.memory_space<vmem>>, vector<1x512xf32>,
    } else {
    }
    %c1_i32 = arith.constant 1 : i32
    %3 = arith.muli %arg0, %c1_i32 : i32
    %4 = arith.addi %3, %arg1 : i32
    %c4_i32 = arith.constant 4 : i32
    %5 = arith.muli %4, %c4_i32 : i32
    %c4_i32_1 = arith.constant 4 : i32
    %6 = arith.subi %c4_i32_1, %5 : i32
    %7 = tpu.iota {dimensions = array<i32: 0>} : vector<4x1xi32>
    %8 = vector.broadcast %6 : i32 to vector<4x1xi32>
    %9 = arith.cmpi slt, %7, %8 : vector<4x1xi32>
    %c0 = arith.constant 0 : index
    %c0_2 = arith.constant 0 : index
    %10 = vector.load %arg2[%c0, %c0_2] : memref<4x512xf32, #tpu.memory_space<vmem>>, vector<4x512xf32>
    %c0_3 = arith.constant 0 : index
    %c0_4 = arith.constant 0 : index
    %11 = vector.load %arg3[%c0_3, %c0_4] : memref<4x512xf32, #tpu.memory_space<vmem>>, vector<4x512xf32>
    %12 = arith.subf %10, %11 : vector<4x512xf32>
    %13 = arith.mulf %12, %12 : vector<4x512xf32>
    %cst = arith.constant 0.000000e+00 : f32
    %14 = vector.shape_cast %9 : vector<4x1xi1> to vector<4x1xi1>
    %15 = vector.broadcast %14 : vector<4x1xi1> to vector<4x512xi1>
    %16 = vector.broadcast %cst : f32 to vector<4x512xf32>
    %17 = arith.select %15, %13, %16 : vector<4x512xi1>, vector<4x512xf32>
    %c0_5 = arith.constant 0 : index
    %c0_6 = arith.constant 0 : index
    %18 = vector.load %arg5[%c0_5, %c0_6] : memref<1x512xf32, #tpu.memory_space<vmem>>, vector<1x512xf32>
    %cst_7 = arith.constant dense<0.000000e+00> : vector<512xf32>
    %19 = vector.multi_reduction <add>, %17, %cst_7 [0] : vector<4x512xf32> to vector<512xf32>
    %20 = vector.shape_cast %19 : vector<512xf32> to vector<1x512xf32>
    %21 = arith.addf %18, %20 : vector<1x512xf32>
    %c0_8 = arith.constant 0 : index
    %c0_9 = arith.constant 0 : index
    %22 = vector.load %arg5[%c0_8, %c0_9] : memref<1x512xf32, #tpu.memory_space<vmem>>, vector<1x512xf32>
    tpu.vector_store %arg5[%c0_8, %c0_9], %21 {strides = array<i32>} : memref<1x512xf32, #tpu.memory_space<vmem>>, vector<1x512xf32>,
    %c0_i32_10 = arith.constant 0 : i32
    %23 = arith.cmpi eq, %arg1, %c0_i32_10 : i32
    %24 = arith.extui %23 : i1 to i32
    %c0_i32_11 = arith.constant 0 : i32
    %25 = arith.cmpi ne, %24, %c0_i32_11 : i32
    scf.if %25 {
      %c0_12 = arith.constant 0 : index
      %c0_13 = arith.constant 0 : index
      %26 = vector.load %arg5[%c0_12, %c0_13] : memref<1x512xf32, #tpu.memory_space<vmem>>, vector<1x512xf32>
      %27 = vector.shape_cast %26 : vector<1x512xf32> to vector<1x1x512xf32>
      %cst_14 = arith.constant dense<0.000000e+00> : vector<1xf32>
      %28 = vector.multi_reduction <add>, %27, %cst_14 [1, 2] : vector<1x1x512xf32> to vector<1xf32>
      %29 = vector.shape_cast %28 : vector<1xf32> to vector<1x1x1xf32>
      %30 = vector.extract %29[0, 0, 0] : f32 from vector<1x1x1xf32>
      %c0_15 = arith.constant 0 : index
      %c0_16 = arith.constant 0 : index
      %31 = memref.load %arg4[%c0_15, %c0_16] : memref<1x1xf32, #tpu.memory_space<smem>>
      memref.store %30, %arg4[%c0_15, %c0_16] : memref<1x1xf32, #tpu.memory_space<smem>>
    } else {
    }
    return
  }
  func.func @transform_0(%arg0: i32, %arg1: i32) -> (i32, i32) {
    %c1_i32 = arith.constant 1 : i32
    %0 = arith.muli %arg0, %c1_i32 : i32
    %1 = arith.addi %0, %arg1 : i32
    %c0_i32 = arith.constant 0 : i32
    %2 = arith.minsi %1, %c0_i32 : i32
    %c0_i32_0 = arith.constant 0 : i32
    %c0_i32_1 = arith.constant 0 : i32
    return %2, %c0_i32_0 : i32, i32
  }
  func.func @transform_1(%arg0: i32, %arg1: i32) -> (i32, i32) {
    %c1_i32 = arith.constant 1 : i32
    %0 = arith.muli %arg0, %c1_i32 : i32
    %1 = arith.addi %0, %arg1 : i32
    %c0_i32 = arith.constant 0 : i32
    %2 = arith.minsi %1, %c0_i32 : i32
    %c0_i32_0 = arith.constant 0 : i32
    %c0_i32_1 = arith.constant 0 : i32
    return %2, %c0_i32_0 : i32, i32
  }
  func.func @transform_2(%arg0: i32, %arg1: i32) -> (i32, i32) {
    %c0_i32 = arith.constant 0 : i32
    %c0_i32_0 = arith.constant 0 : i32
    return %arg0, %c0_i32 : i32, i32
  }
}

</mosaic_0001>

<bundles_post_ra>
// kernel: tpu_custom_call.1
= control target key start
LH: loop header
LB: loop body
LE: loop exit
PB: predicated region body
PF: predicated region fallthrough
CT: control target
= control target key end

     0   :  { %7 = vsyncpa [#allocation4], 0  ;;  %s357_s0 = inlined_call_operand.hbm [shape: f32[4,512], index: 0, kind: input, shape index: {}]   ;;  %s358_s1 = inlined_call_operand.hbm [shape: f32[4,512], index: 1, kind: input, shape index: {}]   ;;  %s359_s2 = inlined_call_operand.hbm [shape: f32[1,1], index: 2, kind: output, shape index: {}]  }
   0x1   :  { %8 = vsyncpa [#allocation7], 0 }
   0x2   :  { %9 = vsyncpa [#allocation5], 0  ;;  %s285_s9 = smov [#allocation3]   ;;  %s286_s11 = smov [#allocation6]  }
   0x3   :  { %s22_s10 = sshll.u32 %s285_s9, 4  ;;  %s38_s12 = sshll.u32 %s286_s11, 4  ;;  %s23_s10 = int_to_ptr.vmem [resolvable:$true] %s22_s10  ;;  %s39_s12 = int_to_ptr.vmem [resolvable:$true] %s38_s12 }
   0x4   :  { %s225_s15 = scalar_lea.hbm %s357_s0, 256 }
   0x5   :  { %p226_p0 = scmp.ne.s32.totalorder %s357_s0, %s225_s15  ;;  %p229_p1 = scmp.lt.u32.totalorder %s225_s15, %s357_s0 }
   0x7   :  { %p231_p2 = pnand %p229_p1, %p226_p0 }
   0x9   :  { %234 = shalt.err (!%p231_p2)
}
   0xa   :  { %s235_s20 = scalar_lea.vmem %s23_s10, 256  ;;  %p240_p4 = scmp.lt.s32.totalorder %s23_s10, %s23_s10 }
   0xb   :  { %p236_p3 = scmp.ne.s32.totalorder %s23_s10, %s235_s20  ;;  %p241_p5 = scmp.lt.s32.totalorder %s235_s20, %s235_s20 }
   0xd   :  { %p242_p6 = por %p241_p5, %p240_p4 }
   0xf   :  { %p243_p7 = pnand %p242_p6, %p236_p3 }
  0x11   :  { %246 = shalt.err (!%p243_p7)
}
  0x12   :  { %25 = dma.hbm_to_vmem [thread:$0]  %s357_s0, 256, %s23_s10, [#allocation4]  }
  0x13   :  { %s247_s25 = scalar_lea.hbm %s358_s1, 256 }
  0x14   :  { %p248_p8 = scmp.ne.s32.totalorder %s358_s1, %s247_s25  ;;  %p251_p9 = scmp.lt.u32.totalorder %s247_s25, %s358_s1 }
  0x16   :  { %p253_p10 = pnand %p251_p9, %p248_p8 }
  0x18   :  { %256 = shalt.err (!%p253_p10)
}
  0x19   :  { %s257_s30 = scalar_lea.vmem %s39_s12, 256  ;;  %p262_p12 = scmp.lt.s32.totalorder %s39_s12, %s39_s12 }
  0x1a   :  { %p258_p11 = scmp.ne.s32.totalorder %s39_s12, %s257_s30  ;;  %p263_p13 = scmp.lt.s32.totalorder %s257_s30, %s257_s30 }
  0x1c   :  { %p264_p0 = por %p263_p13, %p262_p12 }
  0x1e   :  { %p265_p1 = pnand %p264_p0, %p258_p11 }
  0x20   :  { %268 = shalt.err (!%p265_p1)
}
  0x21   :  { %41 = dma.hbm_to_vmem [thread:$0]  %s358_s1, 256, %s39_s12, [#allocation7]  }
  0x22   :  { %279 = dma.done.wait [#allocation4], 256  }
  0x23   :  { %280 = vsyncadd [#allocation4], 4294967040 }
  0x24   :  { %281 = dma.done.wait [#allocation7], 256  }
  0x25   :  { %282 = vsyncadd [#allocation7], 4294967040  ;;  %v58_v0 = vlaneseq  ;;  %v287_v2 = vmov 0.0   ;;  %v70_v4 = vld [vmem:[#allocation3] sm:$0xff]  ;;  %v71_v5 = vld [vmem:[#allocation3 + $0x8] sm:$0xff]  ;;  %vm91_vm2 = vcmask 1043456  }
  0x26   :  { %v72_v6 = vld [vmem:[#allocation6] sm:$0xff]  ;;  %v73_v7 = vld [vmem:[#allocation6 + $0x8] sm:$0xff]  ;;  %v288_v30 = vmov 1966171168   ;;  %vm180_vm3 = vcmask 1040384   ;;  %s269_s6 = scalar_lea.hbm %s359_s2, 16 }
  0x27   :  { %vm329_vm0 = vcmp.lt.s32.totalorder %v58_v0, 512  ;;  %v335_v3 = vshrl.u32 %v58_v0, 7  ;;  %v74_v8 = vsub.f32 %v70_v4, %v72_v6  ;;  %v75_v9 = vsub.f32 %v71_v5, %v73_v7  ;;  %p270_p2 = scmp.ne.s32.totalorder %s359_s2, %s269_s6  ;;  %p273_p3 = scmp.lt.u32.totalorder %s269_s6, %s359_s2 }
  0x28   :  { %62 = vst.msk [vmem:[#allocation2] sm:$0xf] %vm329_vm0, %v287_v2  ;;  %v127_v31 = vunpack.c.l.s4 %v288_v30 }
  0x29   :  { %vm69_vm1 = vcmp.lt.s32.totalorder %v335_v3, 4  ;;  %v76_v10 = vmul.f32 %v74_v8, %v74_v8  ;;  %v77_v11 = vmul.f32 %v75_v9, %v75_v9  ;;  %v162_v58 = vsub.s32 0, %v335_v3  ;;  %p275_p4 = pnand %p273_p3, %p270_p2 }
  0x2a   :  { %v128_v40 = vunpack.c.0.s8 %v127_v31  ;;  %v166_v59 = vsub.s32 1, %v335_v3  ;;  %v170_v60 = vsub.s32 2, %v335_v3  ;;  %v174_v61 = vsub.s32 3, %v335_v3 }
  0x2b   :  { %v82_v12 = vcombine.high %v76_v10, %v76_v10  ;;  %v86_v13 = vsel %vm69_vm1, %v76_v10, 0.0  ;;  %v83_v14 = vcombine.high %v77_v11, %v77_v11  ;;  %v88_v15 = vsel %vm69_vm1, %v77_v11, 0.0 }
  0x2c   :  { %v92_v16 = vsel %vm91_vm2, %v86_v13, 0.0  ;;  %v106_v19 = vsel %vm91_vm2, %v88_v15, 0.0  ;;  %v131_v48 = vsub.s32 %v128_v40, %v335_v3 }
  0x2d   :  { %v87_v17 = vsel %vm69_vm1, %v82_v12, 0.0  ;;  %v93_v18 = vrot.slane %v92_v16, 4  ;;  %v89_v20 = vsel %vm69_vm1, %v83_v14, 0.0  ;;  %v107_v22 = vrot.slane %v106_v19, 4 }
  0x2e   :  { %v99_v21 = vsel %vm91_vm2, %v87_v17, 0.0  ;;  %v113_v25 = vsel %vm91_vm2, %v89_v20, 0.0 }
  0x2f   :  { %v94_v23 = vadd.f32 %v93_v18, %v92_v16  ;;  %v100_v24 = vrot.slane %v99_v21, 4  ;;  %v108_v26 = vadd.f32 %v107_v22, %v106_v19  ;;  %v114_v27 = vrot.slane %v113_v25, 4  ;;  %v90_v55 = vld [vmem:[#allocation2] sm:$0xf] }
  0x31   :  { %v95_v28 = vrot.slane %v94_v23, 2  ;;  %v101_v29 = vadd.f32 %v100_v24, %v99_v21  ;;  %v109_v32 = vrot.slane %v108_v26, 2  ;;  %v115_v33 = vadd.f32 %v114_v27, %v113_v25 }
  0x33   :  { %v96_v34 = vadd.f32 %v95_v28, %v94_v23  ;;  %v102_v35 = vrot.slane %v101_v29, 2  ;;  %v110_v36 = vadd.f32 %v109_v32, %v108_v26  ;;  %v116_v37 = vrot.slane %v115_v33, 2 }
  0x35   :  { %v97_v38 = vrot.slane %v96_v34, 1  ;;  %v103_v39 = vadd.f32 %v102_v35, %v101_v29  ;;  %v111_v41 = vrot.slane %v110_v36, 1  ;;  %v117_v42 = vadd.f32 %v116_v37, %v115_v33 }
  0x37   :  { %v98_v43 = vadd.f32 %v97_v38, %v96_v34  ;;  %v104_v44 = vrot.slane %v103_v39, 1  ;;  %v112_v45 = vadd.f32 %v111_v41, %v110_v36  ;;  %v118_v46 = vrot.slane %v117_v42, 1 }
  0x39   :  { %v105_v47 = vadd.f32 %v104_v44, %v103_v39  ;;  %v119_v49 = vadd.f32 %v118_v46, %v117_v42 }
  0x3b   :  { %v124_v50 = vcombine.low %v98_v43, %v105_v47  ;;  %v125_v51 = vcombine.low %v112_v45, %v119_v49 }
  0x3d   :  { %v132_v52 = vrot.slane %v124_v50, %v131_v48  ;;  %v139_v53 = vrot.slane %v125_v51, %v131_v48 }
  0x3f   :  { %v140_v54 = vcombine.low %v132_v52, %v139_v53 }
  0x41   :  { %v147_v56 = vrot.slane %v140_v54, %v131_v48 }
  0x43   :  { %v149_v57 = vadd.f32 %v147_v56, %v90_v55 }
  0x45   :  { %154 = vst.msk [vmem:[#allocation2] sm:$0xf] %vm329_vm0, %v149_v57 }
  0x4c   :  { %v158_v62 = vld [vmem:[#allocation2] sm:$0xf] }
  0x4d   :  { %v163_v63 = vrot.slane %v158_v62, %v162_v58  ;;  %v167_v0 = vrot.slane %v158_v62, %v166_v59  ;;  %v171_v2 = vrot.slane %v158_v62, %v170_v60  ;;  %v175_v4 = vrot.slane %v158_v62, %v174_v61 }
  0x4f   :  { %v181_v5 = vsel %vm180_vm3, %v163_v63, 0.0  ;;  %v182_v6 = vsel %vm180_vm3, %v167_v0, 0.0  ;;  %v184_v7 = vsel %vm180_vm3, %v171_v2, 0.0  ;;  %v186_v1 = vsel %vm180_vm3, %v175_v4, 0.0 }
  0x50   :  { %v183_v8 = vadd.f32 %v182_v6, %v181_v5 }
  0x52   :  { %v185_v9 = vadd.f32 %v184_v7, %v183_v8 }
  0x54   :  { %v187_v10 = vadd.f32 %v186_v1, %v185_v9 }
  0x56   :  { %188 = vadd.xlane.f32.xlu0 %v187_v10 }
  0xe3   :  { %v189_v11 = vpop.xlane.xlu0 %188 }
  0xe4   :  { %v190_v12 = vrot.slane %v189_v11, 4 }
  0xe6   :  { %v191_v13 = vadd.f32 %v190_v12, %v189_v11 }
  0xe8   :  { %v192_v14 = vrot.slane %v191_v13, 2 }
  0xea   :  { %v193_v15 = vadd.f32 %v192_v14, %v191_v13 }
  0xec   :  { %v194_v3 = vrot.slane %v193_v15, 1 }
  0xee   :  { %v195_v16 = vadd.f32 %v194_v3, %v193_v15 }
  0xf0   :  { %218 = vpush %v195_v16 }
 0x121   :  { %s219_s1 = spop %218 }
 0x122   :  { %198 = sst [smem:[#allocation8]] %s219_s1 }
 0x123   :  { %278 = shalt.err (!%p275_p4)
}
 0x124   :  { %s289_s11 = smov [#allocation8]  }
 0x125   :  { %206 = dma.smem_to_hbm %s289_s11, 16, %s359_s2, [#allocation5]  }
 0x126   :  { %283 = dma.done.wait [#allocation5], 16  }
 0x127   :  { %284 = vsyncadd [#allocation5], 4294967280 }
 0x128   :  { %210 = sfence }
 0x129   :  { %211 = vsyncpa [#allocation4], 1 }
 0x12a   :  { %212 = vsyncpa [#allocation7], 1 }
 0x12b   :  { %213 = vsyncpa [#allocation5], 1 }

</bundles_post_ra>
